<compile_context>
chip_gen: v6e
topology: v6e:2x2x1
jax: 0.10.0
libtpu: 0.0.40
codegen_flags: <defaults>
</compile_context>

<pallas_src>
import functools

import jax
import jax.numpy as jnp
from jax.experimental import pallas as pl
from jax.experimental.pallas import tpu as pltpu


def rnd_loss_kernel(lam_ref, w_ref, b_ref, x_ref, t_ref, loss_ref, *, inv_n):
    # lam is the torch.rand((1,)) scalar, living in SMEM.
    lam = lam_ref[0]

    w_b = w_ref[0]      # modelb weight   [in_f, out_f]
    w_a = w_ref[1]      # modela weight   [in_f, out_f]
    b_b = b_ref[0]      # modelb bias     [1, out_f]
    b_a = b_ref[1]      # modela bias     [1, out_f]

    # (1-lam)*p1 + lam*p2  ==  p1 + lam*(p2 - p1)   (one fewer vmul per vreg)
    w_mix = w_b + lam * (w_a - w_b)
    b_mix = b_b + lam * (b_a - b_b)

    # modelb forward: z = x @ W + b   (MXU matmul, f32 accumulation)
    z = jnp.dot(x_ref[...], w_mix, preferred_element_type=jnp.float32) + b_mix

    # criterion = MSE with mean reduction -> scalar on the scalar path (SMEM)
    d = z - t_ref[...]
    loss_ref[0, 0] = jnp.sum(d * d) * inv_n


def rnd_loss(lam, w_pair, b_pair, x, target):
    """Returns a (1, 1) float32 array (SMEM-backed) holding the scalar loss."""
    batch, out_f = target.shape
    in_f = x.shape[1]
    inv_n = 1.0 / float(batch * out_f)

    # Advisory cost hint: matmul + mix + MSE flops; all operand/result bytes.
    flops = (2 * batch * in_f * out_f            # matmul
             + 3 * (in_f * out_f + out_f)        # interpolation (sub, mul, add)
             + 3 * batch * out_f)                # bias add, diff, square
    bytes_accessed = 4 * (lam.size + w_pair.size + b_pair.size
                          + x.size + target.size + 1)

    vmem = pl.BlockSpec(memory_space=pltpu.MemorySpace.VMEM)
    smem = pl.BlockSpec(memory_space=pltpu.MemorySpace.SMEM)

    return pl.pallas_call(
        functools.partial(rnd_loss_kernel, inv_n=inv_n),
        out_shape=jax.ShapeDtypeStruct((1, 1), jnp.float32),
        in_specs=[
            smem,          # lam (scalar)
            vmem,          # packed weights  [2, in_f, out_f]
            vmem,          # packed biases   [2, 1, out_f]
            vmem,          # x               [batch, in_f]
            vmem,          # target          [batch, out_f]
        ],
        out_specs=smem,    # scalar loss via SMEM (no masked vst / tiny VMEM tile)
        cost_estimate=pl.CostEstimate(
            flops=flops, transcendentals=0, bytes_accessed=bytes_accessed),
    )(lam, w_pair, b_pair, x, target)


# TODO(synk): the torch module mutates modelb's parameters in-place
# (p1.add_/p1.mul_); here the mixing is done functionally inside the kernel and
# only the loss is returned, matching forward()'s return value.

if __name__ == "__main__":
    key = jax.random.PRNGKey(0)
    k1, k2, k3, k4, k5, k6, k7 = jax.random.split(key, 7)

    batch, in_f, out_f = 8, 32, 8

    # Deterministic "modelb" and "modela" Linear(in_f, out_f) parameters,
    # stored pre-transposed as [in_f, out_f] (see layout comment above).
    w_b = 0.1 * jax.random.normal(k1, (in_f, out_f), jnp.float32)
    w_a = 0.1 * jax.random.normal(k2, (in_f, out_f), jnp.float32)
    b_b = 0.1 * jax.random.normal(k3, (1, out_f), jnp.float32)
    b_a = 0.1 * jax.random.normal(k4, (1, out_f), jnp.float32)

    x = jax.random.normal(k5, (batch, in_f), jnp.float32)
    target = jax.random.normal(k6, (batch, out_f), jnp.float32)

    # random_l = torch.rand((1,)) -> deterministic uniform scalar here.
    lam = jax.random.uniform(k7, (1,), jnp.float32)

    # Pack the paired parameters into single operands (fewer DMA descriptors).
    w_pair = jnp.stack([w_b, w_a], axis=0)   # [2, in_f, out_f]
    b_pair = jnp.stack([b_b, b_a], axis=0)   # [2, 1, out_f]

    loss = rnd_loss(lam, w_pair, b_pair, x, target)
    jax.block_until_ready(loss)

    # Pure-JAX reference check (exact torch semantics: (1-lam)*p1 + lam*p2).
    l = lam[0]
    w_mix = (1.0 - l) * w_b + l * w_a
    b_mix = (1.0 - l) * b_b + l * b_a
    ref = jnp.mean((x @ w_mix + b_mix - target) ** 2)
    assert jnp.allclose(loss[0, 0], ref, rtol=1e-5, atol=1e-5), (loss, ref)

    print("KERNEL_OK")
</pallas_src>

<mosaic_0001>
module attributes {stable_mosaic.version = 11 : i64} {
  func.func @rnd_loss_kernel(%arg0: memref<1xf32, #tpu.memory_space<smem>>, %arg1: memref<2x32x8xf32, #tpu.memory_space<vmem>>, %arg2: memref<2x1x8xf32, #tpu.memory_space<vmem>>, %arg3: memref<8x32xf32, #tpu.memory_space<vmem>>, %arg4: memref<8x8xf32, #tpu.memory_space<vmem>>, %arg5: memref<1x1xf32, #tpu.memory_space<smem>>) attributes {dimension_semantics = [], scalar_prefetch = 0 : i64, scratch_operands = 0 : i64, tpu.core_type = #tpu.core_type<tc>} {
    %c0 = arith.constant 0 : index
    %0 = memref.load %arg0[%c0] : memref<1xf32, #tpu.memory_space<smem>>
    %c0_0 = arith.constant 0 : index
    %c0_1 = arith.constant 0 : index
    %c0_2 = arith.constant 0 : index
    %1 = vector.load %arg1[%c0_0, %c0_1, %c0_2] : memref<2x32x8xf32, #tpu.memory_space<vmem>>, vector<1x32x8xf32>
    %2 = vector.shape_cast %1 : vector<1x32x8xf32> to vector<32x8xf32>
    %c1 = arith.constant 1 : index
    %c0_3 = arith.constant 0 : index
    %c0_4 = arith.constant 0 : index
    %3 = vector.load %arg1[%c1, %c0_3, %c0_4] : memref<2x32x8xf32, #tpu.memory_space<vmem>>, vector<1x32x8xf32>
    %4 = vector.shape_cast %3 : vector<1x32x8xf32> to vector<32x8xf32>
    %c0_5 = arith.constant 0 : index
    %c0_6 = arith.constant 0 : index
    %c0_7 = arith.constant 0 : index
    %5 = vector.load %arg2[%c0_5, %c0_6, %c0_7] : memref<2x1x8xf32, #tpu.memory_space<vmem>>, vector<1x1x8xf32>
    %6 = vector.shape_cast %5 : vector<1x1x8xf32> to vector<1x8xf32>
    %c1_8 = arith.constant 1 : index
    %c0_9 = arith.constant 0 : index
    %c0_10 = arith.constant 0 : index
    %7 = vector.load %arg2[%c1_8, %c0_9, %c0_10] : memref<2x1x8xf32, #tpu.memory_space<vmem>>, vector<1x1x8xf32>
    %8 = vector.shape_cast %7 : vector<1x1x8xf32> to vector<1x8xf32>
    %9 = arith.subf %4, %2 : vector<32x8xf32>
    %10 = vector.broadcast %0 : f32 to vector<32x8xf32>
    %11 = arith.mulf %10, %9 : vector<32x8xf32>
    %12 = arith.addf %2, %11 : vector<32x8xf32>
    %13 = arith.subf %8, %6 : vector<1x8xf32>
    %14 = vector.broadcast %0 : f32 to vector<1x8xf32>
    %15 = arith.mulf %14, %13 : vector<1x8xf32>
    %16 = arith.addf %6, %15 : vector<1x8xf32>
    %c0_11 = arith.constant 0 : index
    %c0_12 = arith.constant 0 : index
    %17 = vector.load %arg3[%c0_11, %c0_12] : memref<8x32xf32, #tpu.memory_space<vmem>>, vector<8x32xf32>
    %cst = arith.constant dense<0.000000e+00> : vector<8x8xf32>
    %18 = tpu.matmul %17, %12, %cst {dimension_numbers = #tpu.dot_dimension_numbers<[1], [0], [0], [1], [0, 0, 1, 1], [], []>} : vector<8x32xf32>, vector<32x8xf32>, vector<8x8xf32> -> vector<8x8xf32>
    %19 = vector.broadcast %16 : vector<1x8xf32> to vector<8x8xf32>
    %20 = arith.addf %18, %19 : vector<8x8xf32>
    %c0_13 = arith.constant 0 : index
    %c0_14 = arith.constant 0 : index
    %21 = vector.load %arg4[%c0_13, %c0_14] : memref<8x8xf32, #tpu.memory_space<vmem>>, vector<8x8xf32>
    %22 = arith.subf %20, %21 : vector<8x8xf32>
    %23 = arith.mulf %22, %22 : vector<8x8xf32>
    %24 = vector.shape_cast %23 : vector<8x8xf32> to vector<1x8x8xf32>
    %cst_15 = arith.constant dense<0.000000e+00> : vector<1xf32>
    %25 = vector.multi_reduction <add>, %24, %cst_15 [1, 2] : vector<1x8x8xf32> to vector<1xf32>
    %26 = vector.shape_cast %25 : vector<1xf32> to vector<1x1x1xf32>
    %27 = vector.extract %26[0, 0, 0] : f32 from vector<1x1x1xf32>
    %cst_16 = arith.constant 1.562500e-02 : f32
    %28 = arith.mulf %27, %cst_16 : f32
    %c0_17 = arith.constant 0 : index
    %c0_18 = arith.constant 0 : index
    %29 = memref.load %arg5[%c0_17, %c0_18] : memref<1x1xf32, #tpu.memory_space<smem>>
    memref.store %28, %arg5[%c0_17, %c0_18] : memref<1x1xf32, #tpu.memory_space<smem>>
    return
  }
}

</mosaic_0001>

<bundles_post_ra>
// kernel: tpu_custom_call.1
= control target key start
LH: loop header
LB: loop body
LE: loop exit
PB: predicated region body
PF: predicated region fallthrough
CT: control target
= control target key end

     0   :  { %v199_v4 = vmov 0.0   ;;  %vm200_vm0 = vmmov 0   ;;  %s274_s0 = inlined_call_operand.<no memory space> [shape: f32[1], index: 0, kind: input, shape index: {}]   ;;  %s275_s1 = inlined_call_operand.vmem [shape: f32[2,32,8], index: 1, kind: input, shape index: {}]   ;;  %s276_s2 = inlined_call_operand.vmem [shape: f32[2,1,8], index: 2, kind: input, shape index: {}]   ;;  %s277_s3 = inlined_call_operand.vmem [shape: f32[8,32], index: 3, kind: input, shape index: {}]   ;;  %s278_s4 = inlined_call_operand.vmem [shape: f32[8,8], index: 4, kind: input, shape index: {}]   ;;  %s279_s5 = inlined_call_operand.hbm [shape: f32[1,1], index: 5, kind: output, shape index: {}]  }
   0x1   :  { %v26_v0 = vld [vmem:[%s275_s1 + $0x18] sm:$0xff]  ;;  %v39_v2 = vstv %s274_s0  ;;  %v25_v3 = vld [vmem:[%s275_s1 + $0x10] sm:$0xff]  ;;  %173 = vmatprep.subr.mxu0 %v199_v4  ;;  %v24_v7 = vld [vmem:[%s275_s1 + $0x8] sm:$0xff]  ;;  %181 = vmatprep.mubr.msk.f32.mxu0 %vm200_vm0, %v199_v4 }
   0x2   :  { %v165_v1 = vld [vmem:[%s275_s1 + $0x38] sm:$0xff]  ;;  %v164_v6 = vld [vmem:[%s275_s1 + $0x30] sm:$0xff]  ;;  %v163_v8 = vld [vmem:[%s275_s1 + $0x28] sm:$0xff] }
   0x3   :  { %v38_v5 = vsub.f32 %v165_v1, %v26_v0  ;;  %v37_v9 = vsub.f32 %v164_v6, %v25_v3  ;;  %v36_v10 = vsub.f32 %v163_v8, %v24_v7  ;;  %v23_v11 = vld [vmem:[%s275_s1] sm:$0xff] }
   0x4   :  { %v162_v12 = vld [vmem:[%s275_s1 + $0x20] sm:$0xff] }
   0x5   :  { %v43_v13 = vmul.f32 %v39_v2, %v38_v5  ;;  %v35_v14 = vsub.f32 %v162_v12, %v23_v11  ;;  %v42_v15 = vmul.f32 %v39_v2, %v37_v9  ;;  %v41_v16 = vmul.f32 %v39_v2, %v36_v10 }
   0x6   :  { %11 = vsyncpa [#allocation4], 0  ;;  %v51_v22 = vld [vmem:[%s277_s3] sm:$0xff]  ;;  %vm58_vm1 = vcmask 261120   ;;  %v53_v26 = vlaneseq  ;;  %vm135_vm2 = vcmask 64512   ;;  %s201_s17 = smov [#allocation3]  }
   0x7   :  { %v47_v17 = vadd.f32 %v43_v13, %v26_v0  ;;  %v40_v18 = vmul.f32 %v39_v2, %v35_v14  ;;  %v46_v19 = vadd.f32 %v42_v15, %v25_v3  ;;  %v45_v20 = vadd.f32 %v41_v16, %v24_v7  ;;  %v32_v23 = vld [vmem:[%s276_s2] sm:$0x1]  ;;  %v166_v24 = vld [vmem:[%s276_s2 + $0x1] sm:$0x1] }
   0x8   :  { %v48_v25 = vsub.f32 %v166_v24, %v32_v23  ;;  %v54_v28 = vshrl.u32 %v53_v26, 7  ;;  %v132_v33 = vld [vmem:[%s278_s4] sm:$0xff] }
   0x9   :  { %174 = vmatpush3.msra.mxu0 %v47_v17  ;;  %v44_v21 = vadd.f32 %v40_v18, %v23_v11 }
   0xa   :  { %175 = vmatprep.subr.mxu0 %v199_v4  ;;  %v49_v27 = vmul.f32 %v48_v25, %v39_v2  ;;  %v55_v30 = vsub.s32 0, %v54_v28 }
   0xb   :  { %176 = vmatpush3.msra.mxu0 %v46_v19 }
   0xc   :  { %177 = vmatprep.subr.mxu0 %v199_v4  ;;  %v50_v29 = vadd.f32 %v49_v27, %v32_v23 }
   0xd   :  { %178 = vmatpush3.msra.mxu0 %v45_v20 }
   0xe   :  { %179 = vmatprep.subr.mxu0 %v199_v4  ;;  %v56_v31 = vrot.slane %v50_v29, %v55_v30 }
   0xf   :  { %180 = vmatpush3.msra.mxu0 %v44_v21 }
  0x10   :  { %182 = vmatmul.mubr.msk.f32.vlgmr.msra.gmra.mxu0 %vm58_vm1, %v51_v22 }
  0xd0   :  { %v128_v32 = vpop.f32.mrf.mxu0 }
  0xd1   :  { %v129_v34 = vadd.f32 %v128_v32, %v56_v31 }
  0xd2   :  { %v183_v35 = vpop.f32.mrf.mxu0 }
  0xd3   :  { %v133_v36 = vsub.f32 %v129_v34, %v132_v33 }
  0xd5   :  { %v134_v37 = vmul.f32 %v133_v36, %v133_v36 }
  0xd7   :  { %v136_v38 = vsel %vm135_vm2, %v134_v37, 0.0 }
  0xd8   :  { %137 = vadd.xlane.f32.xlu0 %v136_v38 }
 0x161   :  { %v138_v39 = vpop.xlane.xlu0 %137 }
 0x162   :  { %v139_v40 = vrot.slane %v138_v39, 4 }
 0x164   :  { %v140_v41 = vadd.f32 %v139_v40, %v138_v39 }
 0x166   :  { %v141_v42 = vrot.slane %v140_v41, 2 }
 0x168   :  { %v142_v43 = vadd.f32 %v141_v42, %v140_v41 }
 0x16a   :  { %v143_v44 = vrot.slane %v142_v43, 1 }
 0x16c   :  { %v144_v45 = vadd.f32 %v143_v44, %v142_v43 }
 0x16e   :  { %184 = vpush %v144_v45 }
 0x19f   :  { %s185_s2 = spop %184 }
 0x1a0   :  { %s146_s16 = smul.f32 0.015625, %s185_s2 }
 0x1a2   :  { %148 = sst [smem:[#allocation3]] %s146_s16 }
 0x1a3   :  { %156 = dma.smem_to_hbm %s201_s17, 16, %s279_s5, [#allocation4]  }
 0x1a4   :  { %197 = dma.done.wait [#allocation4], 16  }
 0x1a5   :  { %198 = vsyncadd [#allocation4], 4294967280 }
 0x1a6   :  { %160 = sfence }
 0x1a7   :  { %161 = vsyncpa [#allocation4], 1 }

</bundles_post_ra>
